<compile_context>
chip_gen: v5e
topology: v5e:2x2
jax: 0.10.0
libtpu: 0.0.40
codegen_flags: <defaults>
</compile_context>

<pallas_src>
import functools

import jax
import jax.numpy as jnp
import numpy as np
from jax.experimental import pallas as pl
from jax.experimental.pallas import tpu as pltpu


def _prep(preds_ref, eps):
    """Shared head: recover mask from the -inf sentinel, stabilize, exponentiate."""
    p = preds_ref[...]                       # (TB, N) f32; padding already = -inf
    mask = p == -jnp.inf                     # padding sentinel (folded in wrapper)

    # per-row max for numerical stability; guard all-padded rows (max == -inf).
    max_p = jnp.max(p, axis=1, keepdims=True)
    max_p = jnp.where(max_p == -jnp.inf, 0.0, max_p)
    pm = p - max_p                           # masked entries -> -inf (finite max)
    pm_safe = jnp.where(mask, 0.0, pm)       # avoid transient inf in obs (masked anyway)
    e = jnp.exp(pm)                          # masked entries -> exp(-inf) = 0
    return mask, pm_safe, e


def _finish(obs, mask, out_ref):
    """Reduce the TB rows down to a lane-dense (1, 8, N) partial slab."""
    obs = jnp.where(mask, 0.0, obs)          # observation_loss[mask] = 0
    TB, N = obs.shape
    # (TB, N) -> (TB//8, 8, N) is a pure vreg-regrouping reshape; axis-0 sum is VPU adds.
    out_ref[...] = jnp.sum(obs.reshape(TB // 8, 8, N), axis=0)[None]


def _listmle_kernel_matmul(preds_ref, tri_ref, out_ref, *, eps):
    """Small-N path: reversed cumsum via one MXU matmul against a 0/1 triangular matrix."""
    mask, pm_safe, e = _prep(preds_ref, eps)

    # tri stored bf16 (0/1 is exact); up-cast to f32 so the accumulation is exact.
    # Because the weights are exactly 0/1, the MXU result equals the f32 suffix sum
    # up to accumulation order regardless of the multi-pass f32 decomposition.
    tri = tri_ref[...].astype(jnp.float32)   # (N, N), tri[j, i] = 1 iff j >= i
    cumsums = jnp.dot(e, tri, preferred_element_type=jnp.float32)

    obs = jnp.log(cumsums + eps) - pm_safe
    _finish(obs, mask, out_ref)


def _listmle_kernel_scan(preds_ref, out_ref, *, eps):
    """Large-N path: log2(N)-step inclusive suffix scan (pltpu.roll + masked adds)."""
    mask, pm_safe, e = _prep(preds_ref, eps)

    TB, N = e.shape
    lane = jax.lax.broadcasted_iota(jnp.int32, (TB, N), dimension=1)
    acc = e
    s = 1
    while s < N:                             # static unroll, ceil(log2(N)) steps
        # left-shift by s (circular roll by N - s == np.roll(acc, -s)), zero the wrap.
        shifted = pltpu.roll(acc, shift=N - s, axis=1)
        shifted = jnp.where(lane < N - s, shifted, 0.0)
        acc = acc + shifted
        s *= 2
    cumsums = acc                            # cumsums[b, i] = sum_{j >= i} e[b, j]

    obs = jnp.log(cumsums + eps) - pm_safe
    _finish(obs, mask, out_ref)


def _choose_tile_rows(B, N, itemsize=4):
    """Batch-tile rows.  The batch (M) axis streams through the MXU, so size the
    tile by DMA efficiency / per-step overhead (512-1024 rows ~ HBM roofline)
    under a VMEM budget for the double-buffered preds stream (2*TB*N*4 bytes),
    and prefer an even tile count so both v7x TensorCores get work."""
    budget = 8 << 20                                        # double-buffered input stream
    cap = max(8, (budget // (2 * N * itemsize)) // 8 * 8)
    tb = min(1024, cap)
    if B <= tb:
        return max(8, ((B + 7) // 8) * 8)
    tiles = -(-B // tb)
    if tiles > 1 and tiles % 2:
        tiles += 1                                          # even tile count for 2-TC v7x
    return max(8, ((-(-B // tiles)) + 7) // 8 * 8)


def listmle_loss(teacher_top1_sim_pred, student_top1_sim_pred, *,
                 gamma=1.0, eps=1e-7, perm_key=None, suffix_scan=None):
    """ListMLE loss. Inputs: (B, N) teacher / student similarity scores."""
    y_pred = student_top1_sim_pred.astype(jnp.float32)
    y_true = teacher_top1_sim_pred.astype(jnp.float32)
    B, N = y_pred.shape

    # torch.randperm -> deterministic permutation (randomized tie resolution)
    if perm_key is not None:
        perm = jax.random.permutation(perm_key, N)
    else:
        perm = jnp.arange(N)

    # Descending sort of shuffled teacher scores; compose perm with the sort order
    # so the student preds are gathered from the ORIGINAL array once.
    y_true_shuf = y_true[:, perm]
    order = jnp.argsort(-y_true_shuf, axis=-1)
    y_true_sorted = jnp.take_along_axis(y_true_shuf, order, axis=-1)
    final_idx = perm[order]                                  # (B, N) composed indices
    preds_sorted_by_true = jnp.take_along_axis(y_pred, final_idx, axis=-1)

    # Fold the padding mask into the single streamed operand as a -inf sentinel
    # (fuses with the gather in XLA).  Genuine student scores are assumed finite.
    preds_sorted_by_true = jnp.where(y_true_sorted == -1.0, -jnp.inf,
                                     preds_sorted_by_true)

    # Batch tiling (pad with fully-masked -inf rows; they contribute exactly 0).
    TB = _choose_tile_rows(B, N)
    B_pad = ((B + TB - 1) // TB) * TB
    if B_pad != B:
        preds_sorted_by_true = jnp.pad(preds_sorted_by_true, ((0, B_pad - B), (0, 0)),
                                       constant_values=-jnp.inf)
    num_tiles = B_pad // TB

    use_scan = (N > 512) if suffix_scan is None else bool(suffix_scan)

    out_bytes = 4 * num_tiles * 8 * N
    in_bytes = 4 * B_pad * N

    if use_scan:
        kernel = functools.partial(_listmle_kernel_scan, eps=float(eps))
        in_specs = [pl.BlockSpec((TB, N), lambda i: (i, 0))]
        operands = (preds_sorted_by_true,)
        log2n = max(1, (N - 1).bit_length())
        flops = B_pad * N * (2 * log2n + 6)
        bytes_accessed = in_bytes + out_bytes
        tri_vmem = 0
    else:
        # Hoisted compile-time constant: tri[j, i] = 1.0 iff j >= i (lower triangular).
        # Stored bf16 (exact for 0/1): halves DMA/HBM residency; single-buffered below.
        tri = jnp.asarray(np.tri(N, dtype=np.float32)).astype(jnp.bfloat16)
        kernel = functools.partial(_listmle_kernel_matmul, eps=float(eps))
        in_specs = [
            pl.BlockSpec((TB, N), lambda i: (i, 0)),
            pl.BlockSpec((N, N), lambda i: (0, 0),           # constant block every step
                         pipeline_mode=pl.Buffered(1)),       # no double-buffering needed
        ]
        operands = (preds_sorted_by_true, tri)
        flops = 2 * B_pad * N * N
        bytes_accessed = in_bytes + 2 * N * N + out_bytes
        tri_vmem = 2 * N * N                                  # single-buffered bf16

    # Explicit VMEM budget: double-buffered preds stream + output slab + tri + headroom.
    vmem_bytes = 2 * TB * N * 4 + 2 * 8 * N * 4 + tri_vmem + (4 << 20)
    vmem_limit = int(min(max(vmem_bytes, 32 << 20), 64 << 20))

    cost = pl.CostEstimate(flops=int(flops),
                           transcendentals=int(2 * B_pad * N),   # exp + log
                           bytes_accessed=int(bytes_accessed))

    partials = pl.pallas_call(
        kernel,
        out_shape=jax.ShapeDtypeStruct((num_tiles, 8, N), jnp.float32),
        grid=(num_tiles,),
        in_specs=in_specs,
        out_specs=pl.BlockSpec((1, 8, N), lambda i: (i, 0, 0)),
        compiler_params=pltpu.CompilerParams(
            dimension_semantics=("parallel",),                  # megacore-shard batch tiles
            vmem_limit_bytes=vmem_limit),
        cost_estimate=cost,
    )(*operands)

    # gamma * mean_b( sum_i obs[b, i] )   (padded rows contribute 0; divide by real B)
    return gamma * (jnp.sum(partials) / B)


def _listmle_ref(teacher, student, *, gamma, eps, perm_key):
    """Pure-JAX reference mirroring the PyTorch forward."""
    y_pred = student.astype(jnp.float32)
    y_true = teacher.astype(jnp.float32)
    N = y_pred.shape[-1]
    perm = jax.random.permutation(perm_key, N) if perm_key is not None else jnp.arange(N)
    y_pred = y_pred[:, perm]
    y_true = y_true[:, perm]
    idx = jnp.argsort(-y_true, axis=-1)
    y_true_sorted = jnp.take_along_axis(y_true, idx, axis=-1)
    preds = jnp.take_along_axis(y_pred, idx, axis=-1)
    mask = y_true_sorted == -1.0
    preds = jnp.where(mask, -jnp.inf, preds)
    max_p = jnp.max(preds, axis=1, keepdims=True)
    pm = preds - max_p
    cumsums = jnp.flip(jnp.cumsum(jnp.flip(jnp.exp(pm), axis=1), axis=1), axis=1)
    obs = jnp.log(cumsums + eps) - pm
    obs = jnp.where(mask, 0.0, obs)
    return gamma * jnp.mean(jnp.sum(obs, axis=1))


if __name__ == "__main__":
    # Module hyperparameters (tau is unused in the PyTorch forward pass).
    tau = 0.05       # noqa: F841 — kept for parity with the module __init__
    gamma_ = 0.1
    eps = 1e-7

    key = jax.random.PRNGKey(0)
    k_t, k_s, k_perm = jax.random.split(key, 3)

    B, N = 8, 128    # (batch, list length) — list axis mapped to lanes
    teacher = jax.random.uniform(k_t, (B, N), dtype=jnp.float32, minval=-0.9, maxval=1.0)
    student = jax.random.uniform(k_s, (B, N), dtype=jnp.float32, minval=-0.9, maxval=1.0)
    # Exercise the padding-sentinel mask path: last 16 list slots are padding.
    teacher = teacher.at[:, N - 16:].set(-1.0)

    ref = jax.block_until_ready(
        _listmle_ref(teacher, student, gamma=gamma_, eps=eps, perm_key=k_perm))

    # Small-N (MXU suffix-sum matmul) path — the default for N <= 512.
    loss_mm = jax.block_until_ready(
        listmle_loss(teacher, student, gamma=gamma_, eps=eps, perm_key=k_perm))
    np.testing.assert_allclose(np.asarray(loss_mm), np.asarray(ref), rtol=1e-4, atol=1e-5)

    # Large-N (pltpu.roll log-step suffix scan) path, forced at small N to validate it.
    loss_scan = jax.block_until_ready(
        listmle_loss(teacher, student, gamma=gamma_, eps=eps, perm_key=k_perm,
                     suffix_scan=True))
    np.testing.assert_allclose(np.asarray(loss_scan), np.asarray(ref), rtol=1e-4, atol=1e-5)

    print("KERNEL_OK")
</pallas_src>

<mosaic_0001>
module attributes {stable_mosaic.version = 11 : i64} {
  func.func @_listmle_kernel_matmul(%arg0: i32, %arg1: memref<8x128xf32, #tpu.memory_space<vmem>>, %arg2: memref<128x128xbf16, #tpu.memory_space<vmem>>, %arg3: memref<1x8x128xf32, #tpu.memory_space<vmem>>) attributes {dimension_semantics = [#tpu.dimension_semantics<parallel>], iteration_bounds = array<i64: 1>, scalar_prefetch = 0 : i64, scratch_operands = 0 : i64, tpu.core_type = #tpu.core_type<tc>, window_params = [{transform_indices = @transform_0, window_bounds = array<i64: 8, 128>}, {pipeline_mode = #tpu.pipeline_mode<synchronous>, transform_indices = @transform_1, window_bounds = array<i64: 128, 128>}, {transform_indices = @transform_2, window_bounds = array<i64: 1, 8, 128>}]} {
    %c0 = arith.constant 0 : index
    %c0_0 = arith.constant 0 : index
    %0 = vector.load %arg1[%c0, %c0_0] : memref<8x128xf32, #tpu.memory_space<vmem>>, vector<8x128xf32>
    %cst = arith.constant 0xFF800000 : f32
    %1 = vector.broadcast %cst : f32 to vector<8x128xf32>
    %2 = arith.cmpf oeq, %0, %1 : vector<8x128xf32>
    %cst_1 = arith.constant dense<0xFF800000> : vector<8xf32>
    %3 = vector.multi_reduction <maximumf>, %0, %cst_1 [1] : vector<8x128xf32> to vector<8xf32>
    %4 = vector.shape_cast %3 : vector<8xf32> to vector<8x1xf32>
    %cst_2 = arith.constant 0xFF800000 : f32
    %5 = vector.broadcast %cst_2 : f32 to vector<8x1xf32>
    %6 = arith.cmpf oeq, %4, %5 : vector<8x1xf32>
    %cst_3 = arith.constant 0.000000e+00 : f32
    %7 = vector.broadcast %cst_3 : f32 to vector<8x1xf32>
    %8 = arith.select %6, %7, %4 : vector<8x1xi1>, vector<8x1xf32>
    %9 = vector.broadcast %8 : vector<8x1xf32> to vector<8x128xf32>
    %10 = arith.subf %0, %9 : vector<8x128xf32>
    %cst_4 = arith.constant 0.000000e+00 : f32
    %11 = vector.broadcast %cst_4 : f32 to vector<8x128xf32>
    %12 = arith.select %2, %11, %10 : vector<8x128xi1>, vector<8x128xf32>
    %13 = math.exp %10 : vector<8x128xf32>
    %c0_5 = arith.constant 0 : index
    %c0_6 = arith.constant 0 : index
    %14 = vector.load %arg2[%c0_5, %c0_6] : memref<128x128xbf16, #tpu.memory_space<vmem>>, vector<128x128xbf16>
    %15 = arith.extf %14 : vector<128x128xbf16> to vector<128x128xf32>
    %cst_7 = arith.constant dense<0.000000e+00> : vector<8x128xf32>
    %16 = tpu.matmul %13, %15, %cst_7 {dimension_numbers = #tpu.dot_dimension_numbers<[1], [0], [0], [1], [0, 0, 1, 1], [], []>} : vector<8x128xf32>, vector<128x128xf32>, vector<8x128xf32> -> vector<8x128xf32>
    %cst_8 = arith.constant 1.000000e-07 : f32
    %17 = vector.broadcast %cst_8 : f32 to vector<8x128xf32>
    %18 = arith.addf %16, %17 : vector<8x128xf32>
    %19 = math.log %18 : vector<8x128xf32>
    %20 = arith.subf %19, %12 : vector<8x128xf32>
    %cst_9 = arith.constant 0.000000e+00 : f32
    %21 = vector.broadcast %cst_9 : f32 to vector<8x128xf32>
    %22 = arith.select %2, %21, %20 : vector<8x128xi1>, vector<8x128xf32>
    %23 = vector.shape_cast %22 : vector<8x128xf32> to vector<1x8x128xf32>
    %cst_10 = arith.constant dense<0.000000e+00> : vector<8x128xf32>
    %24 = vector.multi_reduction <add>, %23, %cst_10 [0] : vector<1x8x128xf32> to vector<8x128xf32>
    %25 = vector.shape_cast %24 : vector<8x128xf32> to vector<1x8x128xf32>
    %c0_11 = arith.constant 0 : index
    %c0_12 = arith.constant 0 : index
    %c0_13 = arith.constant 0 : index
    %26 = vector.load %arg3[%c0_11, %c0_12, %c0_13] : memref<1x8x128xf32, #tpu.memory_space<vmem>>, vector<1x8x128xf32>
    tpu.vector_store %arg3[%c0_11, %c0_12, %c0_13], %25 {strides = array<i32>} : memref<1x8x128xf32, #tpu.memory_space<vmem>>, vector<1x8x128xf32>,
    return
  }
  func.func @transform_0(%arg0: i32) -> (i32, i32) {
    %c0_i32 = arith.constant 0 : i32
    %c0_i32_0 = arith.constant 0 : i32
    return %arg0, %c0_i32 : i32, i32
  }
  func.func @transform_1(%arg0: i32) -> (i32, i32) {
    %c0_i32 = arith.constant 0 : i32
    %c0_i32_0 = arith.constant 0 : i32
    %c0_i32_1 = arith.constant 0 : i32
    return %c0_i32, %c0_i32_0 : i32, i32
  }
  func.func @transform_2(%arg0: i32) -> (i32, i32, i32) {
    %c0_i32 = arith.constant 0 : i32
    %c0_i32_0 = arith.constant 0 : i32
    %c0_i32_1 = arith.constant 0 : i32
    return %arg0, %c0_i32, %c0_i32_0 : i32, i32, i32
  }
}

</mosaic_0001>

<bundles_post_ra>
// kernel: tpu_custom_call.1
= control target key start
LH: loop header
LB: loop body
LE: loop exit
PB: predicated region body
PF: predicated region fallthrough
CT: control target
= control target key end

     0   :  { %7 = vsyncpa [#allocation3], 0  ;;  %s288_s0 = inlined_call_operand.hbm [shape: f32[8,128], index: 0, kind: input, shape index: {}]   ;;  %s289_s1 = inlined_call_operand.hbm [shape: bf16[128,128], index: 1, kind: input, shape index: {}]   ;;  %s290_s2 = inlined_call_operand.hbm [shape: f32[1,8,128], index: 2, kind: output, shape index: {}]  }
   0x1   :  { %8 = vsyncpa [#allocation6], 0 }
   0x2   :  { %9 = vsyncpa [#allocation4], 0  ;;  %s15_s11 = sshll.u32 %s288_s0, 4  ;;  %s254_s12 = smov [#allocation2]   ;;  %s16_s11 = int_to_ptr.hbm [resolvable:$true] %s15_s11 }
   0x3   :  { %s17_s13 = sshll.u32 %s254_s12, 4  ;;  %s25_s16 = sshll.u32 %s289_s1, 4  ;;  %s18_s13 = int_to_ptr.vmem [resolvable:$true] %s17_s13  ;;  %s26_s16 = int_to_ptr.hbm [resolvable:$true] %s25_s16 }
   0x4   :  { %20 = dma.hbm_to_vmem [thread:$0]  %s16_s11, 128, %s18_s13, [#allocation3]  }
   0x5   :  { %s255_s17 = smov [#allocation5]   ;;  %s256_s19 = smov 64  }
   0x6   :  { %s27_s18 = sshll.u32 %s255_s17, 4  ;;  %s257_s20 = smov 4   ;;  %s28_s18 = int_to_ptr.vmem [resolvable:$true] %s27_s18 }
   0x7   :  { %33 = dma.hbm_to_vmem [thread:$0]  %s26_s16, 1024, %s28_s18, [#allocation6], %s256_s19, %s256_s19, %s257_s20  }
   0x8   :  { %248 = dma.done.wait [#allocation3], 128  }
   0x9   :  { %249 = vsyncadd [#allocation3], 4294967168 }
   0xa   :  { %250 = dma.done.wait [#allocation6], 1024  }
   0xb   :  { %251 = vsyncadd [#allocation6], 4294966272  ;;  %v280_v0 = vld [vmem:[#allocation2] sm:$0xff]  ;;  %v165_v2 = vld [vmem:[#allocation5 + $0x30] sm:$0xff]   ;;  %s258_s0 = smov [#allocation7]   ;;  %s117_s23 = sshll.u32 %s290_s2, 4  ;;  %s118_s23 = int_to_ptr.hbm [resolvable:$true] %s117_s23 }
   0xc   :  { %v166_v1 = vld [vmem:[#allocation5 + $0x38] sm:$0xff]   ;;  %44 = vmax.xlane.f32.xlu0 %v280_v0  ;;  %v155_v5 = vunpack.c.h.bf16 %v165_v2  ;;  %v164_v6 = vld [vmem:[#allocation5 + $0x28] sm:$0xff]   ;;  %v154_v7 = vunpack.c.l.bf16 %v165_v2  ;;  %v163_v9 = vld [vmem:[#allocation5 + $0x20] sm:$0xff]   ;;  %vm43_vm1 = vcmp.eq.f32.partialorder %v280_v0, -inf  ;;  %s115_s1 = sshll.u32 %s258_s0, 4  ;;  %s116_s1 = int_to_ptr.vmem [resolvable:$true] %s115_s1 }
   0xd   :  { %v159_v3 = vunpack.c.h.bf16 %v166_v1  ;;  %v158_v4 = vunpack.c.l.bf16 %v166_v1  ;;  %v151_v8 = vunpack.c.h.bf16 %v164_v6  ;;  %v150_v10 = vunpack.c.l.bf16 %v164_v6  ;;  %v162_v12 = vld [vmem:[#allocation5 + $0x18] sm:$0xff]   ;;  %v161_v16 = vld [vmem:[#allocation5 + $0x10] sm:$0xff]   ;;  %v160_v19 = vld [vmem:[#allocation5 + $0x8] sm:$0xff]  }
   0xe   :  { %v147_v11 = vunpack.c.h.bf16 %v163_v9  ;;  %v146_v13 = vunpack.c.l.bf16 %v163_v9  ;;  %v143_v14 = vunpack.c.h.bf16 %v162_v12  ;;  %v142_v15 = vunpack.c.l.bf16 %v162_v12  ;;  %v129_v22 = vld [vmem:[#allocation5] sm:$0xff]  }
   0xf   :  { %84 = vmatpush.msra.mxu0 %v159_v3  ;;  %v139_v17 = vunpack.c.h.bf16 %v161_v16  ;;  %v138_v18 = vunpack.c.l.bf16 %v161_v16  ;;  %v135_v20 = vunpack.c.h.bf16 %v160_v19  ;;  %v134_v21 = vunpack.c.l.bf16 %v160_v19 }
  0x10   :  { %v131_v23 = vunpack.c.h.bf16 %v129_v22  ;;  %v130_v24 = vunpack.c.l.bf16 %v129_v22 }
  0x11   :  { %85 = vmatpush.msra.mxu0 %v158_v4 }
  0x13   :  { %86 = vmatpush.msra.mxu0 %v155_v5 }
  0x15   :  { %87 = vmatpush.msra.mxu0 %v154_v7 }
  0x17   :  { %88 = vmatpush.msra.mxu0 %v151_v8 }
  0x19   :  { %89 = vmatpush.msra.mxu0 %v150_v10 }
  0x1b   :  { %90 = vmatpush.msra.mxu0 %v147_v11 }
  0x1d   :  { %91 = vmatpush.msra.mxu0 %v146_v13 }
  0x1f   :  { %92 = vmatpush.msra.mxu0 %v143_v14 }
  0x21   :  { %93 = vmatpush.msra.mxu0 %v142_v15 }
  0x23   :  { %94 = vmatpush.msra.mxu0 %v139_v17 }
  0x25   :  { %95 = vmatpush.msra.mxu0 %v138_v18 }
  0x27   :  { %96 = vmatpush.msra.mxu0 %v135_v20 }
  0x29   :  { %97 = vmatpush.msra.mxu0 %v134_v21 }
  0x2b   :  { %98 = vmatpush.msra.mxu0 %v131_v23 }
  0x2d   :  { %99 = vmatpush.msra.mxu0 %v130_v24 }
  0x7f   :  { %v45_v25 = vpop.xlane.xlu0 %44 }
  0x80   :  { %vm46_vm0 = vcmp.eq.f32.partialorder %v45_v25, -inf }
  0x81   :  { %v47_v26 = vsel %vm46_vm0, 0.0, %v45_v25 }
  0x82   :  { %v48_v27 = vsub.f32 %v280_v0, %v47_v26 }
  0x84   :  { %v50_v28 = vmul.f32 1.442695, %v48_v27  ;;  %v49_v34 = vsel %vm43_vm1, 0.0, %v48_v27 }
  0x86   :  { %172 = vpow2.f32 %v50_v28 }
  0x8c   :  { %v173_v29 = vpop.eup %172 }
  0x8d   :  { %100 = vmatmul.f32.vlgmr.msra.gmra.mxu0 %v173_v29 }
 0x10a   :  { %v101_v30 = vpop.f32.mrf.mxu0 }
 0x10b   :  { %v102_v31 = vadd.f32 1e-07, %v101_v30 }
 0x10d   :  { %174 = vlog2.f32 %v102_v31 }
 0x113   :  { %v175_v32 = vpop.eup %174 }
 0x114   :  { %v105_v33 = vmul.f32 0.6931472, %v175_v32 }
 0x116   :  { %v106_v35 = vsub.f32 %v105_v33, %v49_v34 }
 0x118   :  { %v107_v36 = vsel %vm43_vm1, 0.0, %v106_v35 }
 0x119   :  { %109 = vst [vmem:[#allocation7] sm:$0xff] %v107_v36 }
 0x11a   :  { %120 = dma.vmem_to_hbm [thread:$0]  %s116_s1, 128, %s118_s23, [#allocation4]  }
 0x11b   :  { %252 = dma.done.wait [#allocation4], 128  }
 0x11c   :  { %253 = vsyncadd [#allocation4], 4294967168 }
 0x11d   :  { %125 = vsyncpa [#allocation3], 1 }
 0x11e   :  { %126 = vsyncpa [#allocation6], 1 }
 0x11f   :  { %127 = vsyncpa [#allocation4], 1 }

</bundles_post_ra>
